<compile_context>
chip_gen: v7x
topology: tpu7x:2x2x1
jax: 0.10.0
libtpu: 0.0.40
codegen_flags: <defaults>
</compile_context>

<pallas_src>
import jax
import jax.numpy as jnp
from jax.experimental import pallas as pl
from jax.experimental.pallas import tpu as pltpu


# Below this many output elements, an XLA broadcast (fusable into consumers)
# beats the fixed pallas_call launch overhead.
_MIN_PALLAS_ELEMENTS = 1 << 16


def _round_up(x: int, m: int) -> int:
    return ((x + m - 1) // m) * m


def _constant_kernel(param_ref, o_ref):
    # param_ref: (1, TN) learned row, resident across the batch grid axis.
    # o_ref:     (TB, TN) output tile. Pure broadcast-store (HBM-write bound).
    o_ref[...] = jnp.broadcast_to(param_ref[...], o_ref.shape)


def _pallas_broadcast(param: jax.Array, batch_size: int) -> jax.Array:
    size = param.shape[1]
    dtype = param.dtype
    nbytes = jnp.dtype(dtype).itemsize

    # Lane-dense layout: pad `size` up to a multiple of 128.
    size_p = _round_up(size, 128)

    # Tile sizes. Keep (TB*TN*bytes)*2 (double-buffered output) a few MiB so
    # the same config fits v7x's 64 MiB VMEM as well as v5e/v6e's 128 MiB.
    if size_p <= 2048:
        tn = size_p                         # full (padded) lane extent
    else:
        tn = 1024                           # multiple of 128
        size_p = _round_up(size_p, tn)      # no partial blocks on lane axis
    tb = batch_size if batch_size <= 512 else 512   # full dim or multiple of 8

    param_p = param
    if size_p != size:
        param_p = jnp.pad(param, ((0, 0), (0, size_p - size)))

    grid = (pl.cdiv(batch_size, tb), size_p // tn)

    out = pl.pallas_call(
        _constant_kernel,
        out_shape=jax.ShapeDtypeStruct((batch_size, size_p), dtype),
        grid=grid,
        in_specs=[
            # Param block depends only on the lane-grid index: it stays
            # resident across the batch axis (no redundant HBM reads).
            pl.BlockSpec((1, tn), lambda i, j: (0, j)),
        ],
        out_specs=pl.BlockSpec((tb, tn), lambda i, j: (i, j)),
        compiler_params=pltpu.CompilerParams(
            dimension_semantics=("parallel", "parallel"),
        ),
        cost_estimate=pl.CostEstimate(
            flops=0,
            transcendentals=0,
            bytes_accessed=batch_size * size_p * nbytes + size_p * nbytes,
        ),
    )(param_p)

    if size_p != size:
        out = out[:, :size]
    return out


def constant_module_forward(
    input_m: jax.Array,
    param: jax.Array,
    *,
    min_pallas_elements: int = _MIN_PALLAS_ELEMENTS,
) -> jax.Array:
    """Equivalent of ConstantModule.forward.

    input_m : (batch, in_dim)  -- only its batch size is used (as in PyTorch).
    param   : (1, size)        -- the learned constant row.
    returns : (batch, size)    -- param broadcast over the batch dimension.
    """
    batch_size = input_m.shape[0]
    size = param.shape[1]
    if batch_size * size < min_pallas_elements:
        # Tiny output: launch overhead dominates; let XLA fuse the broadcast.
        return jnp.broadcast_to(param, (batch_size, size))
    return _pallas_broadcast(param, batch_size)


if __name__ == "__main__":
    key = jax.random.PRNGKey(0)
    k_param, k_input = jax.random.split(key)

    batch = 2
    size = 32          # ConstantModule(size=32)
    in_dim = 16        # input_m feature dim (irrelevant to the output)

    # Deterministic "normal_" init of the parameter, shape (1, size).
    param = jax.random.normal(k_param, (1, size), dtype=jnp.float32)
    # Example input; only its batch dimension matters.
    input_m = jax.random.normal(k_input, (batch, in_dim), dtype=jnp.float32)

    ref = jnp.broadcast_to(param, (batch, size))

    # 1) Default dispatch: tiny shape takes the fused-XLA fast path.
    out_fast = jax.block_until_ready(constant_module_forward(input_m, param))
    assert out_fast.shape == (batch, size)
    assert out_fast.dtype == param.dtype
    assert jnp.allclose(out_fast, ref)

    # 2) Force the Pallas path (exercises lane-padding + tiled grid) at the
    #    same small shape and check against the reference.
    out_pallas = jax.block_until_ready(
        constant_module_forward(input_m, param, min_pallas_elements=0)
    )
    assert out_pallas.shape == (batch, size)
    assert out_pallas.dtype == param.dtype
    assert jnp.allclose(out_pallas, ref)

    # 3) Slightly larger (still small) shape through the Pallas path.
    batch2, size2 = 16, 256
    param2 = jax.random.normal(k_param, (1, size2), dtype=jnp.float32)
    input2 = jax.random.normal(k_input, (batch2, in_dim), dtype=jnp.float32)
    out2 = jax.block_until_ready(
        constant_module_forward(input2, param2, min_pallas_elements=0)
    )
    assert out2.shape == (batch2, size2)
    assert jnp.allclose(out2, jnp.broadcast_to(param2, (batch2, size2)))

    print("KERNEL_OK")
</pallas_src>

<mosaic_0001>
module attributes {stable_mosaic.version = 11 : i64} {
  func.func @_constant_kernel(%arg0: i32, %arg1: i32, %arg2: memref<1x128xf32, #tpu.memory_space<vmem>>, %arg3: memref<2x128xf32, #tpu.memory_space<vmem>>) attributes {dimension_semantics = [#tpu.dimension_semantics<parallel>, #tpu.dimension_semantics<parallel>], iteration_bounds = array<i64: 1, 1>, scalar_prefetch = 0 : i64, scratch_operands = 0 : i64, tpu.core_type = #tpu.core_type<tc>, window_params = [{transform_indices = @transform_0, window_bounds = array<i64: 1, 128>}, {transform_indices = @transform_1, window_bounds = array<i64: 2, 128>}]} {
    %c0 = arith.constant 0 : index
    %c0_0 = arith.constant 0 : index
    %0 = vector.load %arg2[%c0, %c0_0] : memref<1x128xf32, #tpu.memory_space<vmem>>, vector<1x128xf32>
    %1 = vector.shape_cast %0 : vector<1x128xf32> to vector<1x128xf32>
    %2 = vector.broadcast %1 : vector<1x128xf32> to vector<2x128xf32>
    %c0_1 = arith.constant 0 : index
    %c0_2 = arith.constant 0 : index
    %3 = vector.load %arg3[%c0_1, %c0_2] : memref<2x128xf32, #tpu.memory_space<vmem>>, vector<2x128xf32>
    tpu.vector_store %arg3[%c0_1, %c0_2], %2 {strides = array<i32>} : memref<2x128xf32, #tpu.memory_space<vmem>>, vector<2x128xf32>,
    return
  }
  func.func @transform_0(%arg0: i32, %arg1: i32) -> (i32, i32) {
    %c0_i32 = arith.constant 0 : i32
    %c0_i32_0 = arith.constant 0 : i32
    return %c0_i32, %arg1 : i32, i32
  }
  func.func @transform_1(%arg0: i32, %arg1: i32) -> (i32, i32) {
    %c0_i32 = arith.constant 0 : i32
    return %arg0, %arg1 : i32, i32
  }
}

</mosaic_0001>

<bundles_post_ra>
// kernel: tpu_custom_call.1
= control target key start
LH: loop header
LB: loop body
LE: loop exit
PB: predicated region body
PF: predicated region fallthrough
CT: control target
= control target key end

     0   :  { %6 = vsyncpa [#allocation3], 0  ;;  %s131_s0 = inlined_call_operand.hbm [shape: f32[1,128], index: 0, kind: input, shape index: {}]   ;;  %s132_s1 = inlined_call_operand.hbm [shape: f32[2,128], index: 1, kind: output, shape index: {}]  }
   0x1   :  { %7 = vsyncpa [#allocation4], 0  ;;  %s95_s6 = smov [#allocation2]   ;;  %s47_s10 = scalar_lea.hbm %s131_s0, 16 }
   0x2   :  { %s14_s7 = sshll.u32 %s95_s6, 4  ;;  %p48_p0 = scmp.ne.s32.totalorder %s131_s0, %s47_s10  ;;  %s15_s7 = int_to_ptr.vmem [resolvable:$true] %s14_s7 }
   0x3   :  { %p51_p1 = scmp.lt.u32.totalorder %s47_s10, %s131_s0 }
   0x5   :  { %p53_p2 = pnand %p51_p1, %p48_p0 }
   0x7   :  { %56 = shalt.err (!%p53_p2)
}
   0x8   :  { %s57_s15 = scalar_lea.vmem %s15_s7, 16  ;;  %s61_s16 = scalar_lea.vmem %s15_s7, 32 }
   0x9   :  { %p58_p3 = scmp.ne.s32.totalorder %s15_s7, %s57_s15  ;;  %p62_p4 = scmp.lt.s32.totalorder %s15_s7, %s15_s7 }
   0xa   :  { %p63_p5 = scmp.lt.s32.totalorder %s61_s16, %s57_s15 }
   0xc   :  { %p64_p6 = por %p63_p5, %p62_p4 }
   0xe   :  { %p65_p7 = pnand %p64_p6, %p58_p3 }
  0x10   :  { %68 = shalt.err (!%p65_p7)
}
  0x11   :  { %17 = dma.hbm_to_vmem [thread:$0]  %s131_s0, 16, %s15_s7, [#allocation3]  }
  0x12   :  { %91 = dma.done.wait [#allocation3], 16  }
  0x13   :  { %92 = vsyncadd [#allocation3], 4294967280  ;;  %s96_s19 = smov [#allocation5]   ;;  %v44_v0 = vld [vmem:[#allocation2] ss:$0 sm:$0xff] }
  0x14   :  { %s35_s20 = sshll.u32 %s96_s19, 4  ;;  %28 = vst [vmem:[#allocation5] sm:$0x3] %v44_v0  ;;  %s36_s20 = int_to_ptr.vmem [resolvable:$true] %s35_s20 }
  0x15   :  { %s69_s21 = scalar_lea.vmem %s36_s20, 32  ;;  %p74_p9 = scmp.lt.s32.totalorder %s36_s20, %s36_s20 }
  0x16   :  { %p70_p8 = scmp.ne.s32.totalorder %s36_s20, %s69_s21  ;;  %p75_p10 = scmp.lt.s32.totalorder %s69_s21, %s69_s21 }
  0x18   :  { %p76_p11 = por %p75_p10, %p74_p9 }
  0x1a   :  { %p77_p12 = pnand %p76_p11, %p70_p8 }
  0x1c   :  { %80 = shalt.err (!%p77_p12)
}
  0x1d   :  { %s81_s24 = scalar_lea.hbm %s132_s1, 32 }
  0x1e   :  { %p82_p13 = scmp.ne.s32.totalorder %s132_s1, %s81_s24  ;;  %p85_p0 = scmp.lt.u32.totalorder %s81_s24, %s132_s1 }
  0x20   :  { %p87_p1 = pnand %p85_p0, %p82_p13 }
  0x22   :  { %90 = shalt.err (!%p87_p1)
}
  0x23   :  { %38 = dma.vmem_to_hbm [thread:$0]  %s36_s20, 32, %s132_s1, [#allocation4]  }
  0x24   :  { %93 = dma.done.wait [#allocation4], 32  }
  0x25   :  { %94 = vsyncadd [#allocation4], 4294967264 }
  0x26   :  { %42 = vsyncpa [#allocation3], 1 }
  0x27   :  { %43 = vsyncpa [#allocation4], 1 }

</bundles_post_ra>
